<compile_context>
chip_gen: v7x
topology: tpu7x:2x2x1
jax: 0.10.0
libtpu: 0.0.40
codegen_flags: <defaults>
</compile_context>

<pallas_src>
import functools

import jax
import jax.numpy as jnp
from jax.experimental import pallas as pl
from jax.experimental.pallas import tpu as pltpu

EPS = 1e-5

# Slimmable-net width multipliers (same as the PyTorch module).
width_mult_list = [i / 32 for i in range(1, 33)]


# --------------------------- hardware budgets --------------------------------


@functools.lru_cache(maxsize=1)
def _vmem_capacity_bytes():
    try:
        return int(pltpu.get_tpu_info().vmem_capacity_bytes)
    except Exception:
        return 64 * 1024 * 1024   # conservative default (v7x per-core VMEM)


def _budgets():
    """(scoped_vmem_cap, target_block_bytes, fused_max_slab_bytes)."""
    cap = _vmem_capacity_bytes()
    scoped_cap = max(32 << 20, cap - (8 << 20))          # headroom below physical
    target_block = (4 << 20) if cap >= (96 << 20) else (2 << 20)
    fused_max = cap // 5                                  # ~25 MiB v5e/v6e, ~12 MiB v7x
    return scoped_cap, target_block, fused_max


# ----------------------------- kernels ---------------------------------------


def _bn_stats_kernel(x_ref, sum_ref, ssq_ref, *, hw, hw_tile, need_mask,
                     lane_partial):
    """Per-batch-chunk partial sum / sum-of-squares over (nb, C, hw_tile) blocks."""

    @pl.when(pl.program_id(1) == 0)
    def _init():
        sum_ref[...] = jnp.zeros_like(sum_ref)
        ssq_ref[...] = jnp.zeros_like(ssq_ref)

    x = x_ref[...].astype(jnp.float32)                    # (nb, C, hw_tile)
    if need_mask:
        # cdiv grid over HW: zero the padded tail of the last tile.
        pos = pl.program_id(1) * hw_tile + jax.lax.broadcasted_iota(
            jnp.int32, (1, 1, hw_tile), 2)
        x = jnp.where(pos < hw, x, 0.0)

    if lane_partial:
        # Lane-partial accumulation: unrolled 128-lane column adds stay on the
        # VALU slots; the single cross-lane reduce happens in the JAX glue.
        s = x[:, :, 0:128]
        q = s * s
        for k in range(1, hw_tile // 128):
            xk = x[:, :, k * 128:(k + 1) * 128]
            s = s + xk
            q = q + xk * xk                               # (nb, C, 128)
    else:
        s = jnp.sum(x, axis=2, keepdims=True)             # (nb, C, 1)
        q = jnp.sum(x * x, axis=2, keepdims=True)

    sum_ref[...] += jnp.sum(s, axis=0, keepdims=True)     # (1, C, lanes_out)
    ssq_ref[...] += jnp.sum(q, axis=0, keepdims=True)


def _bn_norm_kernel(x_ref, scale_ref, bias_ref, o_ref):
    """Fused epilogue: y = x * scale + bias (per-channel coefficients)."""
    x = x_ref[...].astype(jnp.float32)                    # (nb, C, hw_tile)
    o_ref[...] = (x * scale_ref[...] + bias_ref[...]).astype(o_ref.dtype)


def _bn_fused_kernel(x_ref, g_ref, b_ref, o_ref, scale_ref, bias_ref):
    """Small-activation path: slab resident in VMEM; phase 0 stats, phase 1 norm."""

    @pl.when(pl.program_id(0) == 0)
    def _stats():
        x = x_ref[...].astype(jnp.float32)                # (N, C, HW)
        cnt = jnp.float32(x.shape[0] * x.shape[2])
        s = jnp.sum(jnp.sum(x, axis=2, keepdims=True), axis=0, keepdims=True)
        ssq = jnp.sum(jnp.sum(x * x, axis=2, keepdims=True), axis=0,
                      keepdims=True)
        mean = s / cnt
        var = jnp.maximum(ssq / cnt - mean * mean, 0.0)
        inv_std = jax.lax.rsqrt(var + EPS)
        scale = g_ref[...] * inv_std                      # (1, C, 1)
        scale_ref[...] = scale
        bias_ref[...] = b_ref[...] - mean * scale

    @pl.when(pl.program_id(0) == 1)
    def _norm():
        x = x_ref[...].astype(jnp.float32)
        o_ref[...] = (x * scale_ref[...] + bias_ref[...]).astype(o_ref.dtype)


# ----------------------------- tiling helpers --------------------------------


def _pick_hw_tile(hw, c, itemsize, target):
    """Pick an HW tile with block bytes ~ target.  Returns (hw_tile, need_mask)."""
    row_bytes = c * itemsize
    if hw * row_bytes <= target or hw <= 128:
        return hw, False                                   # full-extent lane block
    max_tile = max(128, ((target // row_bytes) // 128) * 128)
    max_tile = min(max_tile, (hw // 128) * 128)
    if hw % 128 == 0:
        tile = max_tile
        while hw % tile != 0:
            tile -= 128
        if 2 * tile >= max_tile:                           # near-target clean divisor
            return tile, False
    # cdiv grid over HW; the padded tail is masked in the stats kernel.
    return max_tile, (hw % max_tile) != 0


def _pick_nb(n, block_bytes_one, target):
    """Largest divisor of n whose folded block stays within the byte target."""
    budget = max(1, target // max(1, block_bytes_one))
    for d in range(min(n, budget), 0, -1):
        if n % d == 0:
            return d
    return 1


# ----------------------------- wrappers --------------------------------------


def _bn_two_pass(x3, gamma, beta, target_block_bytes=None):
    """Tiled two-phase BN for activations that should not sit whole in VMEM."""
    n, c, hw = x3.shape
    itemsize = x3.dtype.itemsize
    scoped_cap, target_default, _ = _budgets()
    target = target_block_bytes or target_default

    hw_tile, need_mask = _pick_hw_tile(hw, c, itemsize, target)
    nb = _pick_nb(n, c * hw_tile * itemsize, target)
    n_b = n // nb
    n_hw = -(-hw // hw_tile)
    block_bytes = nb * c * hw_tile * itemsize
    numel = n * c * hw

    lane_partial = (hw_tile % 128 == 0) and (hw_tile // 128) <= 64
    lanes_out = 128 if lane_partial else 1

    vmem_limit = int(min(scoped_cap,
                         max(16 << 20, 6 * block_bytes + (4 << 20))))

    stats_kernel = functools.partial(
        _bn_stats_kernel, hw=hw, hw_tile=hw_tile,
        need_mask=need_mask, lane_partial=lane_partial)

    # Pass 1: per-batch-chunk partial stats (batch axis "parallel" -> megacore).
    sums, ssqs = pl.pallas_call(
        stats_kernel,
        out_shape=(
            jax.ShapeDtypeStruct((n_b, c, lanes_out), jnp.float32),
            jax.ShapeDtypeStruct((n_b, c, lanes_out), jnp.float32),
        ),
        grid=(n_b, n_hw),
        in_specs=[pl.BlockSpec((nb, c, hw_tile), lambda i, j: (i, 0, j),
                               pipeline_mode=pl.Buffered(3))],
        out_specs=(
            pl.BlockSpec((1, c, lanes_out), lambda i, j: (i, 0, 0)),
            pl.BlockSpec((1, c, lanes_out), lambda i, j: (i, 0, 0)),
        ),
        compiler_params=pltpu.CompilerParams(
            dimension_semantics=("parallel", "arbitrary"),
            vmem_limit_bytes=vmem_limit,
        ),
        cost_estimate=pl.CostEstimate(
            flops=3 * numel, transcendentals=0,
            bytes_accessed=numel * itemsize),
    )(x3)

    # Tiny (C-element) epilogue coefficients; plain JAX glue.
    cnt = jnp.float32(n * hw)
    s = jnp.sum(sums, axis=(0, 2))
    q = jnp.sum(ssqs, axis=(0, 2))
    mean = s / cnt
    # TODO(synk): E[x^2]-mean^2 loses precision for strongly off-centered
    # activations; a shifted two-pass variance would match PyTorch to ~1e-6.
    var = jnp.maximum(q / cnt - mean * mean, 0.0)
    inv_std = jax.lax.rsqrt(var + EPS)
    g = gamma.astype(jnp.float32)
    scale = (g * inv_std).reshape(1, c, 1)
    bias = (beta.astype(jnp.float32) - mean * g * inv_std).reshape(1, c, 1)

    # Pass 2: y = x * scale + bias; fully parallel grid (megacore-friendly).
    out3 = pl.pallas_call(
        _bn_norm_kernel,
        out_shape=jax.ShapeDtypeStruct((n, c, hw), x3.dtype),
        grid=(n_b, n_hw),
        in_specs=[
            pl.BlockSpec((nb, c, hw_tile), lambda i, j: (i, 0, j)),
            pl.BlockSpec((1, c, 1), lambda i, j: (0, 0, 0)),
            pl.BlockSpec((1, c, 1), lambda i, j: (0, 0, 0)),
        ],
        out_specs=pl.BlockSpec((nb, c, hw_tile), lambda i, j: (i, 0, j)),
        compiler_params=pltpu.CompilerParams(
            dimension_semantics=("parallel", "parallel"),
            vmem_limit_bytes=vmem_limit,
        ),
        cost_estimate=pl.CostEstimate(
            flops=2 * numel, transcendentals=0,
            bytes_accessed=2 * numel * itemsize),
        # TODO(synk): input_output_aliases={0: 0} would reuse x's HBM buffer,
        # but only when the caller donates x; left off to avoid a defensive copy.
    )(x3, scale, bias)
    return out3


def _bn_fused(x3, gamma, beta):
    """Small-activation BN: single pallas_call, 1 HBM read + 1 HBM write."""
    n, c, hw = x3.shape
    numel = n * c * hw
    itemsize = x3.dtype.itemsize
    scoped_cap, _, _ = _budgets()
    slab_bytes = numel * itemsize
    vmem_limit = int(min(scoped_cap,
                         max(16 << 20, 4 * slab_bytes + (4 << 20))))
    g = gamma.reshape(1, c, 1).astype(jnp.float32)
    b = beta.reshape(1, c, 1).astype(jnp.float32)
    # TODO(synk): for C below the sublane granule (8 for f32 / 16 for bf16) a
    # (N*C, HW)-folded layout would avoid ~50% sublane padding in VMEM.
    return pl.pallas_call(
        _bn_fused_kernel,
        out_shape=jax.ShapeDtypeStruct((n, c, hw), x3.dtype),
        grid=(2,),  # phase 0: stats, phase 1: normalize (x stays resident)
        in_specs=[
            pl.BlockSpec((n, c, hw), lambda p: (0, 0, 0)),
            pl.BlockSpec((1, c, 1), lambda p: (0, 0, 0)),
            pl.BlockSpec((1, c, 1), lambda p: (0, 0, 0)),
        ],
        out_specs=pl.BlockSpec((n, c, hw), lambda p: (0, 0, 0)),
        scratch_shapes=[
            pltpu.VMEM((1, c, 1), jnp.float32),   # scale
            pltpu.VMEM((1, c, 1), jnp.float32),   # bias
        ],
        compiler_params=pltpu.CompilerParams(
            dimension_semantics=("arbitrary",),
            vmem_limit_bytes=vmem_limit,
        ),
        cost_estimate=pl.CostEstimate(
            flops=5 * numel, transcendentals=c,
            bytes_accessed=2 * numel * itemsize),
    )(x3, g, b)


@functools.partial(jax.jit, static_argnames=("two_pass",))
def switchable_batchnorm2d(x_nchw, gamma, beta, two_pass=None):
    """Training-mode BatchNorm2d on NCHW input via Pallas kernels."""
    n, c, h, w = x_nchw.shape
    # Free, contiguous reshape: spatial goes to the lane axis (no transpose).
    x3 = x_nchw.reshape(n, c, h * w)
    if two_pass is None:
        _, _, fused_max = _budgets()
        two_pass = (x_nchw.size * x_nchw.dtype.itemsize) > fused_max
    out3 = _bn_two_pass(x3, gamma, beta) if two_pass else _bn_fused(x3, gamma, beta)
    return out3.reshape(n, c, h, w)


class SwitchableBatchNorm2dPallas:
    """Mirror of the PyTorch SwitchableBatchNorm2d (forward only)."""

    def __init__(self, num_features_list, key):
        assert len(num_features_list) == len(width_mult_list)
        self.num_features_list = num_features_list
        self.num_features = max(num_features_list)
        self.width_mult = max(width_mult_list)
        self.ignore_model_profiling = True
        # One (gamma, beta) pair per BN in the ModuleList (seeded random init).
        self.params = []
        for i, nf in enumerate(num_features_list):
            kg, kb = jax.random.split(jax.random.fold_in(key, i))
            gamma = jax.random.normal(kg, (nf,), jnp.float32) * 0.1 + 1.0
            beta = jax.random.normal(kb, (nf,), jnp.float32) * 0.1
            self.params.append((gamma, beta))
        # TODO(synk): running_mean/running_var updates (training-mode side
        # effect of nn.BatchNorm2d) are not modeled; only the forward output is.

    def __call__(self, x_nchw, two_pass=None):
        idx = width_mult_list.index(self.width_mult)
        gamma, beta = self.params[idx]
        assert x_nchw.shape[1] == gamma.shape[0]
        return switchable_batchnorm2d(x_nchw, gamma, beta, two_pass=two_pass)


def _reference_bn(x_nchw, gamma, beta):
    x = x_nchw.astype(jnp.float32)
    mean = jnp.mean(x, axis=(0, 2, 3), keepdims=True)
    var = jnp.mean((x - mean) ** 2, axis=(0, 2, 3), keepdims=True)
    y = (x - mean) / jnp.sqrt(var + EPS)
    y = y * gamma[None, :, None, None] + beta[None, :, None, None]
    return y.astype(x_nchw.dtype)


if __name__ == "__main__":
    key = jax.random.PRNGKey(0)
    kx, kp, kx2, kg2, kb2 = jax.random.split(key, 5)

    # Small synthetic config: max channel count = 4 (the active BN at max width).
    num_features_list = [max(1, (i * 4) // 32) for i in range(1, 33)]
    module = SwitchableBatchNorm2dPallas(num_features_list, kp)

    # Input: NCHW, channels == max(num_features_list) == 4.
    x = jax.random.normal(kx, (2, 4, 16, 16), jnp.float32)

    idx = width_mult_list.index(module.width_mult)
    gamma, beta = module.params[idx]
    y_ref = _reference_bn(x, gamma, beta)

    # Default path: small activation -> fused single-fetch kernel.
    y = jax.block_until_ready(module(x))
    assert y.shape == x.shape and y.dtype == x.dtype
    assert jnp.allclose(y, y_ref, atol=1e-4, rtol=1e-4)

    # Also exercise the tiled two-pass path used for large activations.
    y2 = jax.block_until_ready(module(x, two_pass=True))
    assert jnp.allclose(y2, y_ref, atol=1e-4, rtol=1e-4)

    # Exercise the masked, cdiv-tiled path (HW not divisible by 128) at small
    # scale by forcing a tiny per-block byte target.
    x2 = jax.random.normal(kx2, (2, 8, 15, 20), jnp.float32)   # HW = 300
    gamma2 = jax.random.normal(kg2, (8,), jnp.float32) * 0.1 + 1.0
    beta2 = jax.random.normal(kb2, (8,), jnp.float32) * 0.1
    y3 = _bn_two_pass(x2.reshape(2, 8, 300), gamma2, beta2,
                      target_block_bytes=4096)
    y3 = jax.block_until_ready(y3).reshape(2, 8, 15, 20)
    y3_ref = _reference_bn(x2, gamma2, beta2)
    assert jnp.allclose(y3, y3_ref, atol=1e-4, rtol=1e-4)

    print("KERNEL_OK")
</pallas_src>

<mosaic_0001>
module attributes {stable_mosaic.version = 11 : i64} {
  func.func @_bn_fused_kernel(%arg0: i32, %arg1: memref<2x4x256xf32, #tpu.memory_space<vmem>>, %arg2: memref<1x4x1xf32, #tpu.memory_space<vmem>>, %arg3: memref<1x4x1xf32, #tpu.memory_space<vmem>>, %arg4: memref<2x4x256xf32, #tpu.memory_space<vmem>>, %arg5: memref<1x4x1xf32, #tpu.memory_space<vmem>>, %arg6: memref<1x4x1xf32, #tpu.memory_space<vmem>>) attributes {dimension_semantics = [#tpu.dimension_semantics<arbitrary>], iteration_bounds = array<i64: 2>, scalar_prefetch = 0 : i64, scratch_operands = 2 : i64, tpu.core_type = #tpu.core_type<tc>, window_params = [{pipeline_mode = #tpu.pipeline_mode<synchronous>, transform_indices = @transform_0, window_bounds = array<i64: 2, 4, 256>}, {pipeline_mode = #tpu.pipeline_mode<synchronous>, transform_indices = @transform_1, window_bounds = array<i64: 1, 4, 1>}, {pipeline_mode = #tpu.pipeline_mode<synchronous>, transform_indices = @transform_2, window_bounds = array<i64: 1, 4, 1>}, {pipeline_mode = #tpu.pipeline_mode<synchronous>, transform_indices = @transform_3, window_bounds = array<i64: 2, 4, 256>}]} {
    %c0_i32 = arith.constant 0 : i32
    %0 = arith.cmpi eq, %arg0, %c0_i32 : i32
    %1 = arith.extui %0 : i1 to i32
    %c0_i32_0 = arith.constant 0 : i32
    %2 = arith.cmpi ne, %1, %c0_i32_0 : i32
    scf.if %2 {
      %c0 = arith.constant 0 : index
      %c0_2 = arith.constant 0 : index
      %c0_3 = arith.constant 0 : index
      %6 = vector.load %arg1[%c0, %c0_2, %c0_3] : memref<2x4x256xf32, #tpu.memory_space<vmem>>, vector<2x4x256xf32>
      %cst = arith.constant dense<0.000000e+00> : vector<2x4xf32>
      %7 = vector.multi_reduction <add>, %6, %cst [2] : vector<2x4x256xf32> to vector<2x4xf32>
      %8 = vector.shape_cast %7 : vector<2x4xf32> to vector<2x4x1xf32>
      %cst_4 = arith.constant dense<0.000000e+00> : vector<4x1xf32>
      %9 = vector.multi_reduction <add>, %8, %cst_4 [0] : vector<2x4x1xf32> to vector<4x1xf32>
      %10 = vector.shape_cast %9 : vector<4x1xf32> to vector<1x4x1xf32>
      %11 = arith.mulf %6, %6 : vector<2x4x256xf32>
      %cst_5 = arith.constant dense<0.000000e+00> : vector<2x4xf32>
      %12 = vector.multi_reduction <add>, %11, %cst_5 [2] : vector<2x4x256xf32> to vector<2x4xf32>
      %13 = vector.shape_cast %12 : vector<2x4xf32> to vector<2x4x1xf32>
      %cst_6 = arith.constant dense<0.000000e+00> : vector<4x1xf32>
      %14 = vector.multi_reduction <add>, %13, %cst_6 [0] : vector<2x4x1xf32> to vector<4x1xf32>
      %15 = vector.shape_cast %14 : vector<4x1xf32> to vector<1x4x1xf32>
      %cst_7 = arith.constant 5.120000e+02 : f32
      %16 = vector.broadcast %cst_7 : f32 to vector<1x4x1xf32>
      %17 = arith.divf %10, %16 : vector<1x4x1xf32>
      %cst_8 = arith.constant 5.120000e+02 : f32
      %18 = vector.broadcast %cst_8 : f32 to vector<1x4x1xf32>
      %19 = arith.divf %15, %18 : vector<1x4x1xf32>
      %20 = arith.mulf %17, %17 : vector<1x4x1xf32>
      %21 = arith.subf %19, %20 : vector<1x4x1xf32>
      %cst_9 = arith.constant 0.000000e+00 : f32
      %22 = vector.broadcast %cst_9 : f32 to vector<1x4x1xf32>
      %23 = arith.maximumf %21, %22 : vector<1x4x1xf32>
      %cst_10 = arith.constant 9.99999974E-6 : f32
      %24 = vector.broadcast %cst_10 : f32 to vector<1x4x1xf32>
      %25 = arith.addf %23, %24 : vector<1x4x1xf32>
      %26 = math.rsqrt %25 : vector<1x4x1xf32>
      %c0_11 = arith.constant 0 : index
      %c0_12 = arith.constant 0 : index
      %c0_13 = arith.constant 0 : index
      %27 = vector.load %arg2[%c0_11, %c0_12, %c0_13] : memref<1x4x1xf32, #tpu.memory_space<vmem>>, vector<1x4x1xf32>
      %28 = arith.mulf %27, %26 : vector<1x4x1xf32>
      %c0_14 = arith.constant 0 : index
      %c0_15 = arith.constant 0 : index
      %c0_16 = arith.constant 0 : index
      %29 = vector.load %arg5[%c0_14, %c0_15, %c0_16] : memref<1x4x1xf32, #tpu.memory_space<vmem>>, vector<1x4x1xf32>
      tpu.vector_store %arg5[%c0_14, %c0_15, %c0_16], %28 {strides = array<i32>} : memref<1x4x1xf32, #tpu.memory_space<vmem>>, vector<1x4x1xf32>,
      %c0_17 = arith.constant 0 : index
      %c0_18 = arith.constant 0 : index
      %c0_19 = arith.constant 0 : index
      %30 = vector.load %arg3[%c0_17, %c0_18, %c0_19] : memref<1x4x1xf32, #tpu.memory_space<vmem>>, vector<1x4x1xf32>
      %31 = arith.mulf %17, %28 : vector<1x4x1xf32>
      %32 = arith.subf %30, %31 : vector<1x4x1xf32>
      %c0_20 = arith.constant 0 : index
      %c0_21 = arith.constant 0 : index
      %c0_22 = arith.constant 0 : index
      %33 = vector.load %arg6[%c0_20, %c0_21, %c0_22] : memref<1x4x1xf32, #tpu.memory_space<vmem>>, vector<1x4x1xf32>
      tpu.vector_store %arg6[%c0_20, %c0_21, %c0_22], %32 {strides = array<i32>} : memref<1x4x1xf32, #tpu.memory_space<vmem>>, vector<1x4x1xf32>,
    } else {
    }
    %c1_i32 = arith.constant 1 : i32
    %3 = arith.cmpi eq, %arg0, %c1_i32 : i32
    %4 = arith.extui %3 : i1 to i32
    %c0_i32_1 = arith.constant 0 : i32
    %5 = arith.cmpi ne, %4, %c0_i32_1 : i32
    scf.if %5 {
      %c0 = arith.constant 0 : index
      %c0_2 = arith.constant 0 : index
      %c0_3 = arith.constant 0 : index
      %6 = vector.load %arg1[%c0, %c0_2, %c0_3] : memref<2x4x256xf32, #tpu.memory_space<vmem>>, vector<2x4x256xf32>
      %c0_4 = arith.constant 0 : index
      %c0_5 = arith.constant 0 : index
      %c0_6 = arith.constant 0 : index
      %7 = vector.load %arg5[%c0_4, %c0_5, %c0_6] : memref<1x4x1xf32, #tpu.memory_space<vmem>>, vector<1x4x1xf32>
      %8 = vector.broadcast %7 : vector<1x4x1xf32> to vector<2x4x256xf32>
      %9 = arith.mulf %6, %8 : vector<2x4x256xf32>
      %c0_7 = arith.constant 0 : index
      %c0_8 = arith.constant 0 : index
      %c0_9 = arith.constant 0 : index
      %10 = vector.load %arg6[%c0_7, %c0_8, %c0_9] : memref<1x4x1xf32, #tpu.memory_space<vmem>>, vector<1x4x1xf32>
      %11 = vector.broadcast %10 : vector<1x4x1xf32> to vector<2x4x256xf32>
      %12 = arith.addf %9, %11 : vector<2x4x256xf32>
      %c0_10 = arith.constant 0 : index
      %c0_11 = arith.constant 0 : index
      %c0_12 = arith.constant 0 : index
      %13 = vector.load %arg4[%c0_10, %c0_11, %c0_12] : memref<2x4x256xf32, #tpu.memory_space<vmem>>, vector<2x4x256xf32>
      tpu.vector_store %arg4[%c0_10, %c0_11, %c0_12], %12 {strides = array<i32>} : memref<2x4x256xf32, #tpu.memory_space<vmem>>, vector<2x4x256xf32>,
    } else {
    }
    return
  }
  func.func @transform_0(%arg0: i32) -> (i32, i32, i32) {
    %c0_i32 = arith.constant 0 : i32
    %c0_i32_0 = arith.constant 0 : i32
    %c0_i32_1 = arith.constant 0 : i32
    %c0_i32_2 = arith.constant 0 : i32
    return %c0_i32, %c0_i32_0, %c0_i32_1 : i32, i32, i32
  }
  func.func @transform_1(%arg0: i32) -> (i32, i32, i32) {
    %c0_i32 = arith.constant 0 : i32
    %c0_i32_0 = arith.constant 0 : i32
    %c0_i32_1 = arith.constant 0 : i32
    %c0_i32_2 = arith.constant 0 : i32
    return %c0_i32, %c0_i32_0, %c0_i32_1 : i32, i32, i32
  }
  func.func @transform_2(%arg0: i32) -> (i32, i32, i32) {
    %c0_i32 = arith.constant 0 : i32
    %c0_i32_0 = arith.constant 0 : i32
    %c0_i32_1 = arith.constant 0 : i32
    %c0_i32_2 = arith.constant 0 : i32
    return %c0_i32, %c0_i32_0, %c0_i32_1 : i32, i32, i32
  }
  func.func @transform_3(%arg0: i32) -> (i32, i32, i32) {
    %c0_i32 = arith.constant 0 : i32
    %c0_i32_0 = arith.constant 0 : i32
    %c0_i32_1 = arith.constant 0 : i32
    %c0_i32_2 = arith.constant 0 : i32
    return %c0_i32, %c0_i32_0, %c0_i32_1 : i32, i32, i32
  }
}

</mosaic_0001>

<bundles_post_ra>
// kernel: switchable_batchnorm2d.1
= control target key start
LH: loop header
LB: loop body
LE: loop exit
PB: predicated region body
PF: predicated region fallthrough
CT: control target
= control target key end

     0   :  { %s305_s12 = smov 0   ;;  %s356_s0 = inlined_call_operand.vmem [shape: f32[2,4,256], index: 0, kind: input, shape index: {}]   ;;  %s357_s1 = inlined_call_operand.vmem [shape: f32[1,4,1], index: 1, kind: input, shape index: {}]   ;;  %s358_s2 = inlined_call_operand.vmem [shape: f32[1,4,1], index: 2, kind: input, shape index: {}]   ;;  %s359_s3 = inlined_call_operand.vmem [shape: f32[2,4,256], index: 3, kind: output, shape index: {}]  }
   0x1 LB: > { %s253_s13 = sadd.s32 4294967295, %s281_s12   ;;  %p255_p0 = scmp.ge.s32.totalorder %s281_s12, 1  ;;  %s281_s12 = sphi %s305_s12, %s13_s12  }
   0x2   : > { %p122_p1 = scmp.lt.s32.totalorder %s281_s12, 3 }
   0x4   : > { %p123_p2 = pnand %p255_p0, %p122_p1 }
   0x5   : > { %p256_p3 = scmp.ne.s32.totalorder (!%p123_p2), %s253_s13, 0 }
   0x6   : > { %126 = sbr.rel (%p123_p2) target bundleno = 336 (0x150), region = 32 }
   0xd   : > { %139 = sbr.rel (%p256_p3) target bundleno = 196 (0xc4), region = 36  ;;  %v140_v0 = vld [vmem:[%s356_s0] sm:$0xff] (!%p256_p3)  ;;  %vm148_vm0 = vcmask (!%p256_p3), 1043456   ;;  %v141_v1 = vld [vmem:[%s356_s0 + $0x8] sm:$0xff] (!%p256_p3)  ;;  %vm193_vm1 = vcmask (!%p256_p3), 3072  }
   0xe   : > { %v144_v2 = vcombine.high (!%p256_p3), %v140_v0, %v140_v0  ;;  %v149_v3 = vsel (!%p256_p3), %vm148_vm0, %v140_v0, 0.0  ;;  %v162_v4 = vmul.f32 (!%p256_p3), %v140_v0, %v140_v0  ;;  %v145_v5 = vcombine.high (!%p256_p3), %v141_v1, %v141_v1  ;;  %v191_v36 = vld [vmem:[%s357_s1] sm:$0xf] (!%p256_p3) }
   0xf   : > { %v154_v6 = vsel (!%p256_p3), %vm148_vm0, %v141_v1, 0.0  ;;  %v163_v7 = vmul.f32 (!%p256_p3), %v141_v1, %v141_v1  ;;  %v195_v39 = vld [vmem:[%s358_s2] sm:$0xf] (!%p256_p3) }
  0x10   : > { %v150_v8 = vsel (!%p256_p3), %vm148_vm0, %v144_v2, 0.0  ;;  %v166_v9 = vcombine.high (!%p256_p3), %v162_v4, %v162_v4  ;;  %v170_v10 = vsel (!%p256_p3), %vm148_vm0, %v162_v4, 0.0  ;;  %v155_v11 = vsel (!%p256_p3), %vm148_vm0, %v145_v5, 0.0 }
  0x11   : > { %v151_v12 = vadd.f32 (!%p256_p3), %v150_v8, %v149_v3  ;;  %v167_v13 = vcombine.high (!%p256_p3), %v163_v7, %v163_v7  ;;  %v175_v15 = vsel (!%p256_p3), %vm148_vm0, %v163_v7, 0.0  ;;  %v156_v17 = vadd.f32 (!%p256_p3), %v155_v11, %v154_v6 }
  0x12   : > { %v171_v14 = vsel (!%p256_p3), %vm148_vm0, %v166_v9, 0.0 }
  0x13   : > { %152 = vadd.xlane.f32.xlu0 (!%p256_p3), %v151_v12  ;;  %v172_v16 = vadd.f32 (!%p256_p3), %v171_v14, %v170_v10  ;;  %v176_v18 = vsel (!%p256_p3), %vm148_vm0, %v167_v13, 0.0 }
  0x14   : > { %v177_v19 = vadd.f32 %v176_v18, %v175_v15 }
  0x15   : > { %173 = vadd.xlane.f32.xlu1 %v172_v16 }
  0x17   : > { %157 = vadd.xlane.f32.xlu0 %v156_v17 }
  0x19   : > { %178 = vadd.xlane.f32.xlu1 %v177_v19 }
  0xa0   : > { %v153_v20 = vpop.xlane.xlu0 %152 }
  0xa1   : > { %v159_v23 = vsel %vm148_vm0, %v153_v20, 0.0 }
  0xa2   : > { %v174_v21 = vpop.xlane.xlu1 %173 }
  0xa3   : > { %v180_v27 = vsel %vm148_vm0, %v174_v21, 0.0 }
  0xa4   : > { %v158_v22 = vpop.xlane.xlu0 %157 }
  0xa5   : > { %v160_v24 = vsel %vm148_vm0, %v158_v22, 0.0 }
  0xa6   : > { %v161_v25 = vadd.f32 %v160_v24, %v159_v23  ;;  %v179_v26 = vpop.xlane.xlu1 %178 }
  0xa7   : > { %v181_v28 = vsel %vm148_vm0, %v179_v26, 0.0 }
  0xa8   : > { %v184_v29 = vmul.f32 0.001953125, %v161_v25  ;;  %v182_v30 = vadd.f32 %v181_v28, %v180_v27 }
  0xaa   : > { %v186_v31 = vmul.f32 %v184_v29, %v184_v29  ;;  %v185_v32 = vmul.f32 0.001953125, %v182_v30 }
  0xac   : > { %v187_v33 = vsub.f32 %v185_v32, %v186_v31 }
  0xae   : > { %v188_v34 = vmax.f32 %v187_v33, 0.0 }
  0xb0   : > { %v189_v35 = vadd.f32 1e-05, %v188_v34 }
  0xb2   : > { %272 = vrsqrt.f32 %v189_v35 }
  0xbc   : > { %v273_v37 = vpop.eup %272 }
  0xbd   : > { %v192_v38 = vmul.f32 %v273_v37, %v191_v36 }
  0xbf   : > { %194 = vst.msk [vmem:[#allocation2] sm:$0xf] %vm193_vm1, %v192_v38  ;;  %v196_v40 = vmul.f32 %v192_v38, %v184_v29 }
  0xc1   : > { %v197_v41 = vsub.f32 %v195_v39, %v196_v40 }
  0xc3   : > { %198 = vst.msk [vmem:[#allocation3] sm:$0xf] %vm193_vm1, %v197_v41 }
  0xc4 PF: > { %p257_p4 = scmp.ne.s32.totalorder %s253_s13, 1 }
  0xc5   : > { %v283_v43 = vmov (!%p257_p4), 0   ;;  %v284_v45 = vmov (!%p257_p4), 839922192   ;;  %v213_v47 = vlaneseq (!%p257_p4)  ;;  %v203_v53 = vld [vmem:[%s356_s0] sm:$0xff] (!%p257_p4)  ;;  %v204_v54 = vld [vmem:[%s356_s0 + $0x8] sm:$0xff] (!%p257_p4) }
  0xc6   : > { %202 = sbr.rel (%p257_p4) target bundleno = 336 (0x150), region = 40  ;;  %v205_v42 = vld [vmem:[#allocation2] sm:$0xf] (!%p257_p4)  ;;  %274 = vset.pattern.permute.xlu0 (!%p257_p4), %v283_v43  ;;  %v211_v46 = vunpack.c.l.s4 (!%p257_p4), %v284_v45 }
  0xc7   : > { %208 = vperm.xlu0 (!%p257_p4), %274, %v205_v42   ;;  %v214_v49 = vshrl.u32 (!%p257_p4), %v213_v47, 7 }
  0xc8   : > { %v212_v48 = vunpack.c.0.s8 (!%p257_p4), %v211_v46 }
  0xca   : > { %v220_v44 = vld [vmem:[#allocation3] sm:$0xf] (!%p257_p4)  ;;  %v215_v50 = vsub.s32 (!%p257_p4), %v212_v48, %v214_v49 }
  0xcb   : > { %223 = vperm.xlu0 (!%p257_p4), %274, %v220_v44  }
 0x146   : > { %v209_v51 = vpop.permute.xlu0 %208 }
 0x147   : > { %v216_v52 = vrot.slane %v209_v51, %v215_v50 }
 0x149   : > { %v218_v56 = vmul.f32 %v216_v52, %v203_v53  ;;  %v219_v57 = vmul.f32 %v216_v52, %v204_v54 }
 0x14a   : > { %v224_v55 = vpop.permute.xlu0 %223 }
 0x14b   : > { %v231_v58 = vrot.slane %v224_v55, %v215_v50 }
 0x14d   : > { %v233_v59 = vadd.f32 %v231_v58, %v218_v56  ;;  %v234_v60 = vadd.f32 %v231_v58, %v219_v57 }
 0x14f   : > { %235 = vst [vmem:[%s359_s3] sm:$0xff] %v233_v59  ;;  %236 = vst [vmem:[%s359_s3 + $0x8] sm:$0xff] %v234_v60 }
 0x150 PF: > { %s13_s12 = sadd.s32 1, %s281_s12  }
 0x151   : > { %p10_p5 = scmp.ge.s32.totalorder %s13_s12, 4  }
 0x153   :  { %12 = sbr.rel (!%p10_p5) target bundleno = 1 (0x1), region = 63 }

</bundles_post_ra>
